<compile_context>
chip_gen: v7x
topology: tpu7x:2x2x1
jax: 0.10.0
libtpu: 0.0.40
codegen_flags: <defaults>
</compile_context>

<pallas_src>
import functools

import jax
import jax.numpy as jnp
import numpy as np
from jax.experimental import pallas as pl
from jax.experimental.pallas import tpu as pltpu


def _round_up(a, b):
    return (a + b - 1) // b * b


def _attention_kernel(x_ref, wfc_ref, shift_ref, wcat_ref, bcat_ref,
                      out_ref, acc_ref, *, s_tile, s_total, b_tile, b_pad):
    s_idx = pl.program_id(1)
    num_s = pl.num_programs(1)

    @pl.when(s_idx == 0)
    def _init():
        acc_ref[...] = jnp.zeros_like(acc_ref)

    def _accumulate(xb):
        # Running spatial sum in f32 regardless of the input dtype.
        acc_ref[...] += jnp.sum(xb.astype(jnp.float32), axis=-1)

    needs_mask = (s_total % s_tile) != 0  # static
    if needs_mask:
        # Steady-state steps: no masking work at all.
        @pl.when(s_idx < num_s - 1)
        def _steady():
            _accumulate(x_ref[...])

        # Final (ragged) step: zero the out-of-range lanes before accumulating.
        @pl.when(s_idx == num_s - 1)
        def _tail():
            xb = x_ref[...]
            lane = jax.lax.broadcasted_iota(jnp.int32, (1, 1, s_tile), 2)
            valid = (s_idx * s_tile + lane) < s_total
            _accumulate(jnp.where(valid, xb, jnp.zeros_like(xb)))
    else:
        _accumulate(x_ref[...])

    @pl.when(s_idx == num_s - 1)
    def _finalize():
        pooled = acc_ref[...]                       # (b_tile, C_in), f32
        # fc (1x1 conv): BN scale and 1/(H*W) are pre-folded into wfc; add the
        # folded BN shift and apply ReLU.
        y = jnp.dot(pooled, wfc_ref[...], preferred_element_type=jnp.float32)
        y = jnp.maximum(y + shift_ref[...], 0.0)
        # Fused channel_fc + filter_fc (1/T folded into weights/bias) + sigmoid,
        # written once as a single lane-dense slab.
        z = jnp.dot(y, wcat_ref[...], preferred_element_type=jnp.float32) + bcat_ref[...]
        z = jax.nn.sigmoid(z)
        if b_pad == b_tile:
            out_ref[...] = z
        else:
            # Padded batch rows of the output block are never read (sliced off
            # in the wrapper); write only the valid rows.
            out_ref[0:b_tile, :] = z


def attention_forward(x, params, *, temperature=1.0, s_tile_cap=None):
    """x: (B, C_in, H, W). Returns (channel_attn (B,C_in,1,1), filter_attn (B,C_out,1,1))."""
    B, C_in, H, W = x.shape
    S = H * W
    A = params["fc_w"].shape[1]
    C_out = params["fl_w"].shape[1]

    # ---- fold constants into the (tiny) weights once, outside the kernel ----
    inv_T = 1.0 / float(temperature)
    bn_scale = params["bn_scale"].reshape(1, A)
    bn_shift = params["bn_shift"].reshape(1, A)
    # mean(x) @ fc_w * scale + shift  ==  sum(x) @ (fc_w * scale / (H*W)) + shift
    fc_eff = params["fc_w"] * (bn_scale / float(S))              # (C_in, A)
    # sigmoid((y @ W + b) / T) == sigmoid(y @ (W/T) + b/T); fuse channel & filter.
    w_cat = jnp.concatenate([params["ch_w"], params["fl_w"]], axis=1) * inv_T
    b_cat = jnp.concatenate([params["ch_b"], params["fl_b"]], axis=1) * inv_T
    n_tot = C_in + C_out
    n_pad = _round_up(n_tot, 128)        # lane-dense output slab
    if n_pad != n_tot:
        w_cat = jnp.pad(w_cat, ((0, 0), (0, n_pad - n_tot)))
        b_cat = jnp.pad(b_cat, ((0, 0), (0, n_pad - n_tot)))

    # ---- tiling: batch blocks (parallel) x spatial tiles (arbitrary) ----
    itemsize = jnp.dtype(x.dtype).itemsize
    budget = 10 * 1024 * 1024            # per x buffer; x2 for double buffering
    cin_pad = _round_up(C_in, 8)

    # Keep the contiguous HBM run per (batch, channel) row >= ~2 KiB when the
    # spatial extent allows it (DMA efficiency, esp. bf16 on v7x).
    target_lanes = min(_round_up(S, 128), max(512, 2048 // itemsize))

    divisors = [d for d in range(1, min(B, 8) + 1) if B % d == 0]  # ascending
    fitting = [d for d in divisors
               if d * cin_pad * target_lanes * itemsize <= budget]
    b_tile = max(fitting) if fitting else 1

    # Megacore (v7x has 2 TCs): make sure the "parallel" batch axis has >= 2
    # grid points whenever B >= 2. Harmless on single-TC chips.
    if B // b_tile == 1 and B >= 2:
        smaller = [d for d in divisors if d < b_tile]
        if smaller:
            b_tile = max(smaller)
    num_b = B // b_tile

    # Spatial tile from the byte budget alone (no hard lane cap), 128-aligned.
    lanes = budget // (b_tile * cin_pad * itemsize)
    lanes = max(128, lanes // 128 * 128)
    if s_tile_cap is not None:
        lanes = max(128, min(lanes, (int(s_tile_cap) // 128) * 128))
    s_tile = S if S <= lanes else lanes
    num_s = -(-S // s_tile)

    # Output block rows: must be a multiple of 8 (or the full batch dim).
    if num_b == 1:
        b_pad = b_tile
    else:
        b_pad = b_tile if b_tile % 8 == 0 else _round_up(b_tile, 8)
    out_rows = num_b * b_pad

    # Scoped-VMEM limit: double-buffered x slabs + weights/scratch headroom.
    per_buf = b_tile * cin_pad * _round_up(s_tile, 128) * itemsize
    vmem_limit = max(48 * 1024 * 1024, 2 * per_buf + 8 * 1024 * 1024)

    x3 = x.reshape(B, C_in, S)

    kernel = functools.partial(_attention_kernel, s_tile=s_tile, s_total=S,
                               b_tile=b_tile, b_pad=b_pad)

    out = pl.pallas_call(
        kernel,
        out_shape=jax.ShapeDtypeStruct((out_rows, n_pad), jnp.float32),
        grid_spec=pltpu.PrefetchScalarGridSpec(
            num_scalar_prefetch=0,
            grid=(num_b, num_s),
            in_specs=[
                pl.BlockSpec((b_tile, C_in, s_tile), lambda b, s: (b, 0, s)),
                pl.BlockSpec((C_in, A), lambda b, s: (0, 0)),
                pl.BlockSpec((1, A), lambda b, s: (0, 0)),
                pl.BlockSpec((A, n_pad), lambda b, s: (0, 0)),
                pl.BlockSpec((1, n_pad), lambda b, s: (0, 0)),
            ],
            out_specs=pl.BlockSpec((b_pad, n_pad), lambda b, s: (b, 0)),
            scratch_shapes=[pltpu.VMEM((b_tile, C_in), jnp.float32)],
        ),
        compiler_params=pltpu.CompilerParams(
            dimension_semantics=("parallel", "arbitrary"),
            vmem_limit_bytes=int(vmem_limit),
        ),
    )(x3, fc_eff, bn_shift, w_cat, b_cat)

    # Strip batch-row padding (if any) and the lane padding, then split.
    out = out.reshape(num_b, b_pad, n_pad)[:, :b_tile, :].reshape(B, n_pad)
    ch = out[:, :C_in].reshape(B, C_in, 1, 1)
    fl = out[:, C_in:n_tot].reshape(B, C_out, 1, 1)
    return ch, fl


def make_params(key, in_planes, out_planes, reduction=0.0625, min_channel=16):
    """Deterministic parameter init mirroring the module's _initialize_weights:
    conv weights ~ kaiming_normal(fan_out, relu), conv biases = 0,
    BN gamma=1, beta=0, running stats (0, 1)."""
    A = max(int(in_planes * reduction), min_channel)
    k_fc, k_ch, k_fl = jax.random.split(key, 3)

    def kaiming(k, out_c, in_c):
        std = np.sqrt(2.0 / out_c)  # fan_out for a 1x1 conv = out_channels
        return (std * jax.random.normal(k, (out_c, in_c))).astype(jnp.float32)

    fc_w = kaiming(k_fc, A, in_planes).T          # (C_in, A)
    ch_w = kaiming(k_ch, in_planes, A).T          # (A, C_in)
    fl_w = kaiming(k_fl, out_planes, A).T         # (A, C_out)

    eps = 1e-5
    gamma = jnp.ones((A,), jnp.float32)
    beta = jnp.zeros((A,), jnp.float32)
    running_mean = jnp.zeros((A,), jnp.float32)
    running_var = jnp.ones((A,), jnp.float32)
    bn_scale = gamma / jnp.sqrt(running_var + eps)
    bn_shift = beta - running_mean * bn_scale

    return {
        "fc_w": fc_w,
        "bn_scale": bn_scale.reshape(1, A),
        "bn_shift": bn_shift.reshape(1, A),
        "ch_w": ch_w,
        "ch_b": jnp.zeros((1, in_planes), jnp.float32),
        "fl_w": fl_w,
        "fl_b": jnp.zeros((1, out_planes), jnp.float32),
    }, A


def reference_forward(x, params, temperature=1.0):
    """Pure-JAX reference for correctness checking."""
    B = x.shape[0]
    pooled = jnp.mean(x, axis=(2, 3))                           # (B, C_in)
    y = pooled @ params["fc_w"]                                 # (B, A)
    y = y * params["bn_scale"] + params["bn_shift"]
    y = jnp.maximum(y, 0.0)
    ch = jax.nn.sigmoid((y @ params["ch_w"] + params["ch_b"]) / temperature)
    fl = jax.nn.sigmoid((y @ params["fl_w"] + params["fl_b"]) / temperature)
    return ch.reshape(B, -1, 1, 1), fl.reshape(B, -1, 1, 1)


if __name__ == "__main__":
    key = jax.random.PRNGKey(0)
    k_x, k_p, k_x2 = jax.random.split(key, 3)

    B, C_in, C_out, H, W = 2, 4, 8, 16, 16
    x = jax.random.normal(k_x, (B, C_in, H, W), dtype=jnp.float32)
    params, A = make_params(k_p, C_in, C_out)

    ch_attn, fl_attn = attention_forward(x, params, temperature=1.0)
    jax.block_until_ready((ch_attn, fl_attn))

    ch_ref, fl_ref = reference_forward(x, params, temperature=1.0)
    np.testing.assert_allclose(np.asarray(ch_attn), np.asarray(ch_ref), rtol=1e-5, atol=1e-5)
    np.testing.assert_allclose(np.asarray(fl_attn), np.asarray(fl_ref), rtol=1e-5, atol=1e-5)
    assert ch_attn.shape == (B, C_in, 1, 1)
    assert fl_attn.shape == (B, C_out, 1, 1)

    # Exercise the multi-tile + masked-tail path (H*W not a multiple of the
    # spatial tile) with a small forced tile cap: S = 288 -> three 128-lane
    # steps, only the last one masked, epilogue only at the final step.
    H2, W2 = 16, 18
    x2 = jax.random.normal(k_x2, (B, C_in, H2, W2), dtype=jnp.float32)
    ch2, fl2 = attention_forward(x2, params, temperature=2.0, s_tile_cap=128)
    jax.block_until_ready((ch2, fl2))
    ch2_ref, fl2_ref = reference_forward(x2, params, temperature=2.0)
    np.testing.assert_allclose(np.asarray(ch2), np.asarray(ch2_ref), rtol=1e-5, atol=1e-5)
    np.testing.assert_allclose(np.asarray(fl2), np.asarray(fl2_ref), rtol=1e-5, atol=1e-5)

    print("KERNEL_OK")
</pallas_src>

<mosaic_0001>
module attributes {stable_mosaic.version = 11 : i64} {
  func.func @_attention_kernel(%arg0: i32, %arg1: i32, %arg2: memref<1x4x256xf32, #tpu.memory_space<vmem>>, %arg3: memref<4x16xf32, #tpu.memory_space<vmem>>, %arg4: memref<1x16xf32, #tpu.memory_space<vmem>>, %arg5: memref<16x128xf32, #tpu.memory_space<vmem>>, %arg6: memref<1x128xf32, #tpu.memory_space<vmem>>, %arg7: memref<8x128xf32, #tpu.memory_space<vmem>>, %arg8: memref<1x4xf32, #tpu.memory_space<vmem>>) attributes {dimension_semantics = [#tpu.dimension_semantics<parallel>, #tpu.dimension_semantics<arbitrary>], iteration_bounds = array<i64: 2, 1>, scalar_prefetch = 0 : i64, scratch_operands = 1 : i64, tpu.core_type = #tpu.core_type<tc>, window_params = [{transform_indices = @transform_0, window_bounds = array<i64: 1, 4, 256>}, {pipeline_mode = #tpu.pipeline_mode<synchronous>, transform_indices = @transform_1, window_bounds = array<i64: 4, 16>}, {pipeline_mode = #tpu.pipeline_mode<synchronous>, transform_indices = @transform_2, window_bounds = array<i64: 1, 16>}, {pipeline_mode = #tpu.pipeline_mode<synchronous>, transform_indices = @transform_3, window_bounds = array<i64: 16, 128>}, {pipeline_mode = #tpu.pipeline_mode<synchronous>, transform_indices = @transform_4, window_bounds = array<i64: 1, 128>}, {transform_indices = @transform_5, window_bounds = array<i64: 8, 128>}]} {
    %c0_i32 = arith.constant 0 : i32
    %0 = arith.cmpi eq, %arg1, %c0_i32 : i32
    %1 = arith.extui %0 : i1 to i32
    %c0_i32_0 = arith.constant 0 : i32
    %2 = arith.cmpi ne, %1, %c0_i32_0 : i32
    scf.if %2 {
      %cst_9 = arith.constant 0.000000e+00 : f32
      %11 = vector.broadcast %cst_9 : f32 to vector<1x4xf32>
      %c0_10 = arith.constant 0 : index
      %c0_11 = arith.constant 0 : index
      %12 = vector.load %arg8[%c0_10, %c0_11] : memref<1x4xf32, #tpu.memory_space<vmem>>, vector<1x4xf32>
      tpu.vector_store %arg8[%c0_10, %c0_11], %11 {strides = array<i32>} : memref<1x4xf32, #tpu.memory_space<vmem>>, vector<1x4xf32>,
    } else {
    }
    %c0 = arith.constant 0 : index
    %c0_1 = arith.constant 0 : index
    %c0_2 = arith.constant 0 : index
    %3 = vector.load %arg2[%c0, %c0_1, %c0_2] : memref<1x4x256xf32, #tpu.memory_space<vmem>>, vector<1x4x256xf32>
    %c0_3 = arith.constant 0 : index
    %c0_4 = arith.constant 0 : index
    %4 = vector.load %arg8[%c0_3, %c0_4] : memref<1x4xf32, #tpu.memory_space<vmem>>, vector<1x4xf32>
    %cst = arith.constant dense<0.000000e+00> : vector<1x4xf32>
    %5 = vector.multi_reduction <add>, %3, %cst [2] : vector<1x4x256xf32> to vector<1x4xf32>
    %6 = arith.addf %4, %5 : vector<1x4xf32>
    %c0_5 = arith.constant 0 : index
    %c0_6 = arith.constant 0 : index
    %7 = vector.load %arg8[%c0_5, %c0_6] : memref<1x4xf32, #tpu.memory_space<vmem>>, vector<1x4xf32>
    tpu.vector_store %arg8[%c0_5, %c0_6], %6 {strides = array<i32>} : memref<1x4xf32, #tpu.memory_space<vmem>>, vector<1x4xf32>,
    %c0_i32_7 = arith.constant 0 : i32
    %8 = arith.cmpi eq, %arg1, %c0_i32_7 : i32
    %9 = arith.extui %8 : i1 to i32
    %c0_i32_8 = arith.constant 0 : i32
    %10 = arith.cmpi ne, %9, %c0_i32_8 : i32
    scf.if %10 {
      %c0_9 = arith.constant 0 : index
      %c0_10 = arith.constant 0 : index
      %11 = vector.load %arg8[%c0_9, %c0_10] : memref<1x4xf32, #tpu.memory_space<vmem>>, vector<1x4xf32>
      %c0_11 = arith.constant 0 : index
      %c0_12 = arith.constant 0 : index
      %12 = vector.load %arg3[%c0_11, %c0_12] : memref<4x16xf32, #tpu.memory_space<vmem>>, vector<4x16xf32>
      %cst_13 = arith.constant dense<0.000000e+00> : vector<1x16xf32>
      %13 = tpu.matmul %11, %12, %cst_13 {dimension_numbers = #tpu.dot_dimension_numbers<[1], [0], [0], [1], [0, 0, 1, 1], [], []>} : vector<1x4xf32>, vector<4x16xf32>, vector<1x16xf32> -> vector<1x16xf32>
      %c0_14 = arith.constant 0 : index
      %c0_15 = arith.constant 0 : index
      %14 = vector.load %arg4[%c0_14, %c0_15] : memref<1x16xf32, #tpu.memory_space<vmem>>, vector<1x16xf32>
      %15 = arith.addf %13, %14 : vector<1x16xf32>
      %cst_16 = arith.constant 0.000000e+00 : f32
      %16 = vector.broadcast %cst_16 : f32 to vector<1x16xf32>
      %17 = arith.maximumf %15, %16 : vector<1x16xf32>
      %c0_17 = arith.constant 0 : index
      %c0_18 = arith.constant 0 : index
      %18 = vector.load %arg5[%c0_17, %c0_18] : memref<16x128xf32, #tpu.memory_space<vmem>>, vector<16x128xf32>
      %cst_19 = arith.constant dense<0.000000e+00> : vector<1x128xf32>
      %19 = tpu.matmul %17, %18, %cst_19 {dimension_numbers = #tpu.dot_dimension_numbers<[1], [0], [0], [1], [0, 0, 1, 1], [], []>} : vector<1x16xf32>, vector<16x128xf32>, vector<1x128xf32> -> vector<1x128xf32>
      %c0_20 = arith.constant 0 : index
      %c0_21 = arith.constant 0 : index
      %20 = vector.load %arg6[%c0_20, %c0_21] : memref<1x128xf32, #tpu.memory_space<vmem>>, vector<1x128xf32>
      %21 = arith.addf %19, %20 : vector<1x128xf32>
      %22 = arith.negf %21 : vector<1x128xf32>
      %23 = math.exp %22 : vector<1x128xf32>
      %cst_22 = arith.constant 1.000000e+00 : f32
      %24 = vector.broadcast %cst_22 : f32 to vector<1x128xf32>
      %25 = arith.addf %24, %23 : vector<1x128xf32>
      %26 = arith.divf %24, %25 : vector<1x128xf32>
      %c0_23 = arith.constant 0 : index
      %c0_24 = arith.constant 0 : index
      %27 = vector.load %arg7[%c0_23, %c0_24] : memref<8x128xf32, #tpu.memory_space<vmem>>, vector<1x128xf32>
      tpu.vector_store %arg7[%c0_23, %c0_24], %26 {strides = array<i32>} : memref<8x128xf32, #tpu.memory_space<vmem>>, vector<1x128xf32>,
    } else {
    }
    return
  }
  func.func @transform_0(%arg0: i32, %arg1: i32) -> (i32, i32, i32) {
    %c0_i32 = arith.constant 0 : i32
    %c0_i32_0 = arith.constant 0 : i32
    return %arg0, %c0_i32, %arg1 : i32, i32, i32
  }
  func.func @transform_1(%arg0: i32, %arg1: i32) -> (i32, i32) {
    %c0_i32 = arith.constant 0 : i32
    %c0_i32_0 = arith.constant 0 : i32
    %c0_i32_1 = arith.constant 0 : i32
    return %c0_i32, %c0_i32_0 : i32, i32
  }
  func.func @transform_2(%arg0: i32, %arg1: i32) -> (i32, i32) {
    %c0_i32 = arith.constant 0 : i32
    %c0_i32_0 = arith.constant 0 : i32
    %c0_i32_1 = arith.constant 0 : i32
    return %c0_i32, %c0_i32_0 : i32, i32
  }
  func.func @transform_3(%arg0: i32, %arg1: i32) -> (i32, i32) {
    %c0_i32 = arith.constant 0 : i32
    %c0_i32_0 = arith.constant 0 : i32
    %c0_i32_1 = arith.constant 0 : i32
    return %c0_i32, %c0_i32_0 : i32, i32
  }
  func.func @transform_4(%arg0: i32, %arg1: i32) -> (i32, i32) {
    %c0_i32 = arith.constant 0 : i32
    %c0_i32_0 = arith.constant 0 : i32
    %c0_i32_1 = arith.constant 0 : i32
    return %c0_i32, %c0_i32_0 : i32, i32
  }
  func.func @transform_5(%arg0: i32, %arg1: i32) -> (i32, i32) {
    %c0_i32 = arith.constant 0 : i32
    %c0_i32_0 = arith.constant 0 : i32
    return %arg0, %c0_i32 : i32, i32
  }
}

</mosaic_0001>

<bundles_post_ra>
// kernel: tpu_custom_call.1
= control target key start
LH: loop header
LB: loop body
LE: loop exit
PB: predicated region body
PF: predicated region fallthrough
CT: control target
= control target key end

     0   :  { %10 = vsyncpa [#allocation4], 0  ;;  %s1264_s0 = inlined_call_operand.hbm [shape: f32[2,4,256], index: 0, kind: input, shape index: {}]   ;;  %s1265_s1 = inlined_call_operand.hbm [shape: f32[4,16], index: 1, kind: input, shape index: {}]   ;;  %s1266_s2 = inlined_call_operand.vmem [shape: f32[1,16], index: 2, kind: input, shape index: {}]   ;;  %s1267_s3 = inlined_call_operand.hbm [shape: f32[16,128], index: 3, kind: input, shape index: {}]   ;;  %s1268_s4 = inlined_call_operand.vmem [shape: f32[1,128], index: 4, kind: input, shape index: {}]   ;;  %s1269_s5 = inlined_call_operand.hbm [shape: f32[16,128], index: 5, kind: output, shape index: {}]  }
   0x1   :  { %12 = vsyncpa [#allocation4 + $0x1], 0 }
   0x2   :  { %13 = vsyncpa [#allocation7], 0 }
   0x3   :  { %14 = vsyncpa [#allocation5], 0 }
   0x4   :  { %16 = vsyncpa [#allocation5 + $0x1], 0  ;;  %s1006_s18 = smov 0   ;;  %s1008_s19 = smov 0  }
   0x5   :  { %s1010_s20 = smov 0   ;;  %s1012_s21 = smov 0  }
   0x6   :  { %s1014_s22 = smov 0   ;;  %s1016_s23 = smov 0  }
   0x7 LB: > { %s652_s24 = sadd.s32 4294967295, %s963_s23   ;;  %s653_s25 = sadd.s32 4294967294, %s963_s23   ;;  %s963_s23 = sphi %s1016_s23, %s22_s23   ;;  %s959_s22 = sphi %s1014_s22, %s1292_s22   ;;  %s955_s21 = sphi %s1012_s21, %s1291_s21   ;;  %s951_s20 = sphi %s1010_s20, %s1290_s20   ;;  %s947_s19 = sphi %s1008_s19, %s1289_s19   ;;  %s943_s18 = sphi %s1006_s18, %s1288_s18  }
   0x8   : > { %p56_p0 = scmp.ne.s32.totalorder %s947_s19, %s943_s18  ;;  %p1040_p1 = scmp.eq.s32.totalorder %s652_s24, 0 }
   0x9   : > { %p1044_p2 = scmp.eq.s32.totalorder %s652_s24, 1  ;;  %p170_p3 = scmp.eq.s32.totalorder %s653_s25, 1 }
   0xa   : > { %s1274_s26 = scalar_select %p1040_p1, 1, 0 }
   0xb   : > { %s1275_s27 = scalar_select %p1044_p2, 1, 0 }
   0xc   : > { %p1050_p4 = por %p1040_p1, %p56_p0  ;;  %p654_p5 = scmp.ge.s32.totalorder %s963_s23, 1 }
   0xd   : > { %p1055_p6 = por %p170_p3, %p56_p0  ;;  %p177_p7 = scmp.lt.s32.totalorder %s963_s23, 3 }
   0xe   : > { %s1276_s28 = scalar_select %p1050_p4, 1, 0 }
   0xf   : > { %s1277_s29 = scalar_select %p1055_p6, 1, 0 }
  0x10   : > { %p1060_p8 = pnand %p654_p5, %p177_p7  ;;  %s965_s6 = smov [#allocation6]  }
  0x11   : > { %s190_s7 = sshll.u32 %s965_s6, 4  ;;  %s966_s8 = smov [#allocation8]   ;;  %s191_s7 = int_to_ptr.vmem [resolvable:$true] %s190_s7 }
  0x12   : > { %s1278_s30 = scalar_select %p1060_p8, 1, 0 }
  0x13   : > { %p707_p10 = pneg %p1060_p8  ;;  %s203_s9 = sshll.u32 %s966_s8, 4  ;;  %s1073_s9 = int_to_ptr.vmem [resolvable:$true] %s203_s9 }
  0x14   : > { %s791_s13 = scalar_lea.hbm %s1265_s1, 64 }
  0x15   : > { %p1069_p11 = pnand %p707_p10, %p1040_p1  ;;  %p792_p12 = scmp.ne.s32.totalorder %s1265_s1, %s791_s13 }
  0x16   : > { %p798_p5 = scmp.lt.u32.totalorder %s791_s13, %s1265_s1 }
  0x17   : > { %p793_p13 = pneg %p1069_p11 }
  0x19   : > { %p794_p0 = pnand %p793_p13, %p792_p12 }
  0x1b   : > { %p795_p3 = pneg %p794_p0 }
  0x1d   : > { %p800_p7 = pnand %p798_p5, %p795_p3 }
  0x1f   : > { %803 = shalt.err (!%p800_p7)
}
  0x20   : > { %s804_s24 = scalar_lea.vmem %s191_s7, 64  ;;  %p812_p1 = scmp.lt.s32.totalorder %s191_s7, %s191_s7 }
  0x21   : > { %p805_p10 = scmp.ne.s32.totalorder %s191_s7, %s804_s24  ;;  %p813_p4 = scmp.lt.s32.totalorder %s804_s24, %s804_s24 }
  0x23   : > { %p807_p9 = pnand %p805_p10, %p793_p13  ;;  %p814_p8 = por %p813_p4, %p812_p1 }
  0x25   : > { %p808_p6 = pneg %p807_p9 }
  0x27   : > { %p815_p2 = pnand %p814_p8, %p808_p6 }
  0x29   : > { %818 = shalt.err (!%p815_p2)
}
  0x2a   : > { %710 = dma.hbm_to_vmem [thread:$0]  (!%p1069_p11), %s1265_s1, 64, %s191_s7, [#allocation7]  }
  0x2b   : > { %s819_s12 = scalar_lea.hbm %s1267_s3, 256 }
  0x2c   : > { %p820_p9 = scmp.ne.s32.totalorder %s1267_s3, %s819_s12  ;;  %p826_p2 = scmp.lt.u32.totalorder %s819_s12, %s1267_s3 }
  0x2e   : > { %p822_p1 = pnand %p820_p9, %p793_p13 }
  0x30   : > { %p823_p4 = pneg %p822_p1 }
  0x32   : > { %p828_p6 = pnand %p826_p2, %p823_p4 }
  0x34   : > { %831 = shalt.err (!%p828_p6)
}
  0x35   : > { %s832_s7 = scalar_lea.vmem %s1073_s9, 256  ;;  %p840_p3 = scmp.lt.s32.totalorder %s1073_s9, %s1073_s9 }
  0x36   : > { %p833_p8 = scmp.ne.s32.totalorder %s1073_s9, %s832_s7  ;;  %p841_p5 = scmp.lt.s32.totalorder %s832_s7, %s832_s7 }
  0x38   : > { %p835_p12 = pnand %p833_p8, %p793_p13  ;;  %p842_p7 = por %p841_p5, %p840_p3 }
  0x3a   : > { %p836_p0 = pneg %p835_p12 }
  0x3c   : > { %p843_p10 = pnand %p842_p7, %p836_p0 }
  0x3e   : > { %846 = shalt.err (!%p843_p10)
}
  0x3f   : > { %s967_s17 = smov 128   ;;  %s968_s24 = smov 8  }
  0x40   : > { %713 = dma.hbm_to_vmem [thread:$0]  (!%p1069_p11), %s1267_s3, 256, %s1073_s9, [#allocation7], %s967_s17, %s967_s17, %s968_s24  }
  0x41   : > { %s34_s8 = sadd.s32 1, %s959_s22  ;;  %s43_s11 = sadd.s32 1, %s951_s20 }
  0x42   : > { %p36_p13 = scmp.ge.s32.totalorder %s34_s8, 2  ;;  %p50_p9 = scmp.ne.s32.totalorder %s951_s20, %s947_s19 }
  0x43   : > { %p51_p1 = scmp.eq.s32.totalorder %s963_s23, 0  ;;  %p724_p4 = scmp.lt.s32.totalorder %s963_s23, 2 }
  0x44   : > { %s1294_s8 = smov (%p36_p13, %s34_s8), 0  ;;  %p1280_p6 = scmp.ne.s32.totalorder %s1275_s27, 0 }
  0x45   : > { %p52_p2 = por %p51_p1, %p50_p9  ;;  %s38_s10 = ssub.s32 %s959_s22, %s1294_s8 }
  0x46   : > { %p1132_p8 = por %p1280_p6, %p50_p9  ;;  %s220_s13 = sand.u32 1, %s951_s20  }
  0x47   : > { %p41_p12 = scmp.eq.s32.totalorder %s38_s10, 0  ;;  %s658_s9 = sshll.u32 %s220_s13, 3 }
  0x48   : > { %s674_s14 = sshll.u32 %s959_s22, 7  ;;  %s224_s27 = scalar_lea.vmem [#allocation3], %s658_s9 }
  0x49   : > { %s1141_s15 = scalar_select %p41_p12, %s951_s20, %s43_s11  }
  0x4a   : > { %s1146_s17 = scalar_lea.hbm %s1264_s0, %s674_s14  ;;  %s234_s24 = sshll.u32 %s224_s27, 4  ;;  %s1154_s24 = int_to_ptr.vmem [resolvable:$true] %s234_s24 }
  0x4b   : > { %p1150_p11 = pnand %p724_p4, %p52_p2  ;;  %s221_s6 = scalar_lea.sflag [#allocation4], %s220_s13 }
  0x4c   : > { %s847_s11 = scalar_lea.hbm %s1146_s17, 128  ;;  %s852_s14 = scalar_lea.hbm %s1264_s0, 256 }
  0x4d   : > { %p848_p0 = scmp.ne.s32.totalorder %s1146_s17, %s847_s11  ;;  %p849_p3 = pneg %p1150_p11 }
  0x4e   : > { %p853_p10 = scmp.lt.u32.totalorder %s1146_s17, %s1264_s0  ;;  %p854_p13 = scmp.lt.u32.totalorder %s852_s14, %s847_s11 }
  0x4f   : > { %p850_p5 = pnand %p849_p3, %p848_p0  ;;  %p856_p1 = scmp.lt.u32.totalorder %s847_s11, %s1146_s17 }
  0x50   : > { %p855_p9 = por %p854_p13, %p853_p10 }
  0x51   : > { %p851_p7 = pneg %p850_p5 }
  0x52   : > { %p857_p4 = por %p856_p1, %p855_p9 }
  0x54   : > { %p858_p2 = pnand %p857_p4, %p851_p7 }
  0x56   : > { %861 = shalt.err (!%p858_p2)
}
  0x57   : > { %s862_s13 = scalar_lea.vmem %s1154_s24, 128  ;;  %s969_s27 = smov [#allocation3]  }
  0x58   : > { %p863_p6 = scmp.ne.s32.totalorder %s1154_s24, %s862_s13  ;;  %s867_s10 = sshll.u32 %s969_s27, 4  ;;  %s868_s10 = int_to_ptr.vmem [resolvable:$false] %s867_s10 }
  0x59   : > { %s869_s9 = scalar_lea.vmem %s868_s10, 256  ;;  %p870_p5 = scmp.lt.s32.totalorder %s1154_s24, %s868_s10 }
  0x5a   : > { %p865_p12 = pnand %p863_p6, %p849_p3  ;;  %p871_p10 = scmp.lt.s32.totalorder %s869_s9, %s862_s13 }
  0x5c   : > { %p866_p0 = pneg %p865_p12  ;;  %p872_p13 = por %p871_p10, %p870_p5 }
  0x5e   : > { %p873_p9 = pnand %p872_p13, %p866_p0 }
  0x60   : > { %876 = shalt.err (!%p873_p9)
}
  0x61   : > { %717 = dma.hbm_to_vmem [thread:$0]  (!%p1150_p11), %s1146_s17, 128, %s1154_s24, %s221_s6  }
  0x62   : > { %p1283_p7 = scmp.ne.s32.totalorder %s1278_s30, 0 }
  0x63   : > { %s1184_s11 = sand.u32 (!%p1283_p7), 1, %s947_s19   ;;  %p1284_p3 = scmp.ne.s32.totalorder (!%p1283_p7), %s1276_s28, 0 }
  0x64   : > { %243 = sbr.rel (%p1283_p7) target bundleno = 883 (0x373), region = 40  ;;  %s662_s14 = sshll.u32 (!%p1283_p7), %s1184_s11, 3 }
  0x65   : > { %s246_s16 = scalar_lea.sflag (!%p1283_p7), [#allocation4], %s1184_s11  ;;  %s249_s7 = scalar_lea.vmem (!%p1283_p7), [#allocation3], %s662_s14 }
  0x6b   : > { %930 = dma.done.wait (%p1284_p3), %s246_s16, 128  }
  0x6c   : > { %932 = vsyncadd (%p1284_p3), %s246_s16, 4294967168  ;;  %p1285_p11 = scmp.ne.s32.totalorder %s1274_s26, 0 }
  0x6e   : > { %934 = dma.done.wait (%p1285_p11), [#allocation7], 320  }
  0x6f   : > { %936 = vsyncadd (%p1285_p11), [#allocation7], 4294966976  ;;  %vm296_vm0 = vcmask 1043456   ;;  %v291_v0 = vld [vmem:[%s249_s7] sm:$0xff]  ;;  %v970_v5 = vmov 0   ;;  %v303_v6 = vlaneseq  ;;  %vm289_vm1 = vcmask 24576  }
  0x70   : > { %v294_v1 = vcombine.high %v291_v0, %v291_v0  ;;  %v297_v2 = vsel %vm296_vm0, %v291_v0, 0.0  ;;  %785 = vset.pattern.permute.xlu0 %v970_v5  ;;  %v971_v10 = vmov 1966171168   ;;  %v972_v29 = vmov 0.0   ;;  %v374_v30 = vld [vmem:[#allocation6] sm:$0xf] }
  0x71   : > { %v304_v7 = vshrl.u32 %v303_v6, 7  ;;  %v347_v8 = vand.u32 127, %v303_v6  ;;  %v322_v11 = vunpack.c.l.s4 %v971_v10  ;;  %290 = vst.msk [vmem:[#allocation2] sm:$0x1] %vm289_vm1, %v972_v29  ;;  %680 = vmatprep.subr.mxu0 %v972_v29  ;;  %vm973_vm2 = vmmov 0   ;;  %v454_v38 = vld [vmem:[#allocation8] sm:$0xff] }
  0x72   : > { %v298_v3 = vsel %vm296_vm0, %v294_v1, 0.0  ;;  %681 = vmatpush3.msk.msra.mxu0 %vm296_vm0, %v374_v30  ;;  %682 = vmatprep.mubr.msk.f32.mxu0 %vm973_vm2, %v972_v29  ;;  %vm376_vm3 = vcmask 31744   ;;  %v455_v39 = vld [vmem:[#allocation8 + $0x8] sm:$0xff]  ;;  %v974_v41 = vmov 0.0|0.0   ;;  %vm457_vm4 = vcmask 130048   ;;  %s671_s24 = sshll.u32 %s955_s21, 7 }
  0x73   : > { %v299_v4 = vadd.f32 %v298_v3, %v297_v2  ;;  %v350_v9 = vsub.s32 %v347_v8, %v304_v7  ;;  %v323_v12 = vunpack.c.0.s8 %v322_v11  ;;  %v305_v13 = vsub.s32 0, %v304_v7  ;;  %689 = vmatprep.mubr.msk.f32.mxu1 %vm973_vm2, %v972_v29  ;;  %692 = vmatprep.subr.bf16.mxu1 %v974_v41  ;;  %v375_v42 = vld [vmem:[%s1266_s2] sm:$0x1]  ;;  %s283_s25 = scalar_lea.vmem [#allocation9], %s662_s14  ;;  %s1215_s10 = scalar_lea.hbm %s1269_s5, %s671_s24 }
  0x74   : > { %v309_v14 = vsub.s32 1, %v304_v7  ;;  %v313_v15 = vsub.s32 2, %v304_v7  ;;  %v317_v16 = vsub.s32 3, %v304_v7  ;;  %v693_v40 = vpack.c.bf16 %v455_v39, %v454_v38  ;;  %v456_v47 = vld [vmem:[%s1268_s4] sm:$0x1]  ;;  %s552_s6 = sshll.u32 %s283_s25, 4  ;;  %s1217_s6 = int_to_ptr.vmem [resolvable:$true] %s552_s6 }
  0x75   : > { %300 = vadd.xlane.f32.xlu0 %v299_v4  ;;  %v326_v18 = vsub.s32 %v323_v12, %v304_v7  ;;  %s539_s9 = scalar_lea.sflag [#allocation5], %s1184_s11  ;;  %s877_s16 = scalar_lea.vmem %s1217_s6, 128 }
  0x76   : > { %694 = vmatpush3.bf16.msra.mxu1 %v693_v40  ;;  %p878_p1 = scmp.ne.s32.totalorder %s1217_s6, %s877_s16  ;;  %s975_s21 = smov [#allocation9]  }
  0x77   : > { %s881_s14 = sshll.u32 %s975_s21, 4  ;;  %s882_s14 = int_to_ptr.vmem [resolvable:$false] %s881_s14 }
  0x78   : > { %v292_v34 = vld [vmem:[#allocation2] sm:$0x1]  ;;  %p879_p4 = pnand %p878_p1, %p1132_p8  ;;  %s883_s7 = scalar_lea.vmem %s882_s14, 256 }
  0x79   : > { %p884_p6 = scmp.lt.s32.totalorder %s1217_s6, %s882_s14  ;;  %p885_p12 = scmp.lt.s32.totalorder %s883_s7, %s877_s16 }
  0x7a   : > { %p880_p2 = pneg %p879_p4 }
  0x7b   : > { %p886_p0 = por %p885_p12, %p884_p6 }
  0x7d   : > { %p887_p5 = pnand %p886_p0, %p880_p2 }
 0x102   : > { %v301_v17 = vpop.xlane.xlu0 %300 }
 0x103   : > { %v306_v19 = vrot.slane %v301_v17, %v305_v13  ;;  %v310_v20 = vrot.slane %v301_v17, %v309_v14  ;;  %v314_v21 = vrot.slane %v301_v17, %v313_v15  ;;  %v318_v22 = vrot.slane %v301_v17, %v317_v16 }
 0x105   : > { %v319_v23 = vcombine.low %v306_v19, %v310_v20  ;;  %v320_v24 = vcombine.low %v314_v21, %v318_v22 }
 0x107   : > { %v327_v25 = vrot.slane %v319_v23, %v326_v18  ;;  %v334_v26 = vrot.slane %v320_v24, %v326_v18 }
 0x109   : > { %v335_v27 = vcombine.low %v327_v25, %v334_v26 }
 0x10b   : > { %v342_v28 = vrot.slane %v335_v27, %v326_v18 }
 0x10d   : > { %344 = vperm.xlu0 %785, %v342_v28  }
 0x18c   : > { %v345_v31 = vpop.permute.xlu0 %344 }
 0x18d   : > { %v351_v32 = vrot.slane %v345_v31, %v350_v9 }
 0x18f   : > { %v358_v33 = vrot.slane %v351_v32, %v326_v18 }
 0x191   : > { %v365_v35 = vrot.slane %v358_v33, %v326_v18 }
 0x193   : > { %v367_v36 = vadd.f32 %v365_v35, %v292_v34 }
 0x195   : > { %369 = vst.msk [vmem:[#allocation2] sm:$0x1] %vm289_vm1, %v367_v36 }
 0x19c   : > { %v373_v37 = vld [vmem:[#allocation2] sm:$0x1] }
 0x19d   : > { %683 = vmatmul.mubr.msk.f32.vlgmr.msra.gmra.mrb[0].mxu0 %vm376_vm3, %v373_v37 }
 0x270   : > { %v449_v43 = vpop.f32.mrb[0].mxu0 }
 0x271   : > { %v450_v44 = vadd.f32 %v449_v43, %v375_v42  ;;  %v684_v45 = vpop.f32.mrb[1].mxu0 }
 0x273   : > { %v453_v46 = vmax.f32 %v450_v44, 0.0 }
 0x275   : > { %690 = vmatmul.mubr.msk.f32.vlgmr.msra.gmra.mrb[0].mxu1 %vm457_vm4, %v453_v46 }
 0x348   : > { %v527_v48 = vpop.f32.mrb[0].mxu1 }
 0x349   : > { %v528_v49 = vadd.f32 %v527_v48, %v456_v47  ;;  %v691_v50 = vpop.f32.mrb[1].mxu1 }
 0x34b   : > { %v669_v51 = vmul.f32 -1.442695, %v528_v49 }
 0x34d   : > { %787 = vpow2.f32 %v669_v51 }
 0x357   : > { %v788_v52 = vpop.eup %787 }
 0x358   : > { %v534_v53 = vadd.f32 1.0, %v788_v52 }
 0x35a   : > { %789 = vrcp.f32 %v534_v53 }
 0x364   : > { %v790_v54 = vpop.eup %789 }
 0x365   : > { %537 = vst [vmem:[%s283_s25] sm:$0x1] %v790_v54 }
 0x366   : > { %890 = shalt.err (!%p887_p5)
}
 0x367   : > { %s891_s11 = scalar_lea.hbm %s1215_s10, 128  ;;  %s895_s30 = scalar_lea.hbm %s1269_s5, 256 }
 0x368   : > { %p892_p10 = scmp.ne.s32.totalorder %s1215_s10, %s891_s11  ;;  %p896_p7 = scmp.lt.u32.totalorder %s1215_s10, %s1269_s5 }
 0x369   : > { %p897_p3 = scmp.lt.u32.totalorder %s895_s30, %s891_s11  ;;  %p899_p1 = scmp.lt.u32.totalorder %s891_s11, %s1215_s10 }
 0x36a   : > { %p893_p13 = pnand %p892_p10, %p1132_p8 }
 0x36b   : > { %p898_p11 = por %p897_p3, %p896_p7 }
 0x36c   : > { %p894_p9 = pneg %p893_p13 }
 0x36d   : > { %p900_p4 = por %p899_p1, %p898_p11 }
 0x36f   : > { %p901_p2 = pnand %p900_p4, %p894_p9 }
 0x371   : > { %904 = shalt.err (!%p901_p2)
}
 0x372   : > { %705 = dma.vmem_to_hbm [thread:$0]  (%p1132_p8), %s1217_s6, 128, %s1215_s10, %s539_s9  }
 0x373 PF: > { %s564_s25 = sand.u32 1, %s943_s18   ;;  %p1286_p6 = scmp.ne.s32.totalorder %s1277_s29, 0 }
 0x374   : > { %p1287_p12 = scmp.ge.s32.totalorder %s963_s23, 2  ;;  %s565_s13 = scalar_lea.sflag [#allocation5], %s564_s25 }
 0x376   : > { %p719_p0 = pnand %p1287_p12, %p1286_p6 }
 0x378   : > { %938 = dma.done.wait (!%p719_p0), %s565_s13, 128  }
 0x379   : > { %940 = vsyncadd (!%p719_p0), %s565_s13, 4294967168  ;;  %s22_s23 = sadd.s32 1, %s963_s23   ;;  %s1288_s18 = smov %s947_s19 }
 0x37a   : > { %p19_p5 = scmp.ge.s32.totalorder %s22_s23, 4   ;;  %s1289_s19 = smov %s951_s20 }
 0x37b   : > { %s1290_s20 = smov %s1141_s15  ;;  %s1291_s21 = smov %s959_s22 }
 0x37c   : > { %s1292_s22 = smov %s1294_s8  ;;  %21 = sbr.rel (!%p19_p5) target bundleno = 7 (0x7), region = 101 }
 0x383   :  { %570 = vsyncpa [#allocation4], 1 }
 0x384   :  { %572 = vsyncpa [#allocation4 + $0x1], 1 }
 0x385   :  { %573 = vsyncpa [#allocation7], 1 }
 0x386   :  { %574 = vsyncpa [#allocation5], 1 }
 0x387   :  { %576 = vsyncpa [#allocation5 + $0x1], 1 }

</bundles_post_ra>
